<compile_context>
chip_gen: v6e
topology: v6e:2x2x1
jax: 0.10.0
libtpu: 0.0.40
codegen_flags: <defaults>
</compile_context>

<pallas_src>
import functools

import jax
import jax.numpy as jnp
from jax import lax
from jax.experimental import pallas as pl
from jax.experimental.pallas import tpu as pltpu


def _round_up(x, m):
    return -(-x // m) * m


# --------------------------------------------------------------------------------------
# Kernel: span mean-pool + ScalarMix (both on the MXU) -> linear tag head (lane-dense)
# --------------------------------------------------------------------------------------
def _pool_mix_linear_kernel(spans_ref, *refs, L, S, D, Tm2, block_b):
    hid_refs = refs[:L]
    coeffs_ref, w_ref, b_ref, out_ref = refs[L:]
    cdt = hid_refs[0].dtype  # MXU operand dtype (bf16 in production)

    # --- span -> mean-pool matrix (f32), only the Tm2 tokens that survive [:-1] ------
    spans = spans_ref[...]                                       # [Bb, Tm2, 2] int32
    starts = spans[:, :, 0:1]                                    # [Bb, Tm2, 1]
    ends = spans[:, :, 1:2]                                      # [Bb, Tm2, 1]
    sub = lax.broadcasted_iota(jnp.int32, (1, 1, S), 2)          # broadcastable iota
    in_span = (sub >= starts) & (sub < ends)                     # [Bb, Tm2, S]
    inv_len = 1.0 / jnp.maximum(ends - starts, 1).astype(jnp.float32)
    pool_f32 = in_span.astype(jnp.float32) * inv_len             # [Bb, Tm2, S] f32

    # --- ScalarMix folded onto the MXU: pooled = sum_k (coeff_k * pool) @ hid_k ------
    # f32 accumulator, cdt (bf16) operands; no [Bb, S, D] f32 intermediate.
    pooled = jnp.zeros((block_b, Tm2, D), jnp.float32)
    for k in range(L):
        pm_k = (pool_f32 * coeffs_ref[k]).astype(cdt)            # [Bb, Tm2, S] cdt
        pooled = pooled + jnp.einsum(
            "bts,bsd->btd", pm_k, hid_refs[k][...],
            preferred_element_type=jnp.float32)                  # [Bb, Tm2, D] f32

    # --- linear tag head: one batched matmul, lane-dense padded output ---------------
    Cpad = w_ref.shape[1]
    w3 = jnp.broadcast_to(w_ref[...][None], (block_b, D, Cpad))  # tiny, resident W
    logits = jnp.einsum("btd,bdc->btc", pooled.astype(cdt), w3,
                        preferred_element_type=jnp.float32)      # [Bb, Tm2, Cpad] f32
    out_ref[...] = logits + b_ref[...]


# --------------------------------------------------------------------------------------
# Honest per-step VMEM estimate + budget-driven block sizing
# --------------------------------------------------------------------------------------
def _vmem_bytes(L, bb, S, D, Tm2, Cpad, hid_item):
    Dp = _round_up(D, 128)
    Sp_lane = _round_up(S, 128)
    Ssub = _round_up(S, 8)
    Tp = _round_up(Tm2, 8)
    est = 0
    est += 2 * L * bb * Ssub * Dp * hid_item      # double-buffered hidden-layer streams
    est += 2 * bb * Tp * 128 * 4                  # spans block (lane width 2 pads to 128)
    est += 2 * D * Cpad * hid_item                # W (constant index map; x2 to be safe)
    est += 2 * 8 * Cpad * 4                       # bias
    est += 2 * bb * Tp * Cpad * 4                 # double-buffered f32 logits output
    # kernel-internal temporaries (single-buffered)
    est += bb * Tp * Sp_lane * 4                  # pool_f32
    est += bb * Tp * Sp_lane * hid_item           # per-layer scaled/cast pool matrix
    est += bb * Tp * Dp * 4                       # pooled f32 accumulator
    est += bb * D * Cpad * hid_item               # broadcast W for batched head matmul
    est += 2 << 20                                # headroom for compiler scratch
    return est


def _choose_block_b(B, L, S, D, Tm2, Cpad, hid_item, budget, min_steps=8):
    # Largest divisor of B whose per-step working set fits `budget` while keeping
    # at least min(min_steps, B) grid steps (pipelining depth / megacore sharding).
    target_steps = min(min_steps, B)
    best = 1
    for bb in range(1, B + 1):
        if B % bb:
            continue
        if B // bb < target_steps:
            continue
        if _vmem_bytes(L, bb, S, D, Tm2, Cpad, hid_item) <= budget:
            best = max(best, bb)
    return best


def pool_mix_linear(hidden_list, spans_se, coeffs, w, b):
    L = len(hidden_list)
    B, S, D = hidden_list[0].shape
    Tm2 = spans_se.shape[1]
    C = w.shape[1]
    Cpad = max(128, _round_up(C, 128))            # lane-dense logits store
    cdt = hidden_list[0].dtype
    hid_item = jnp.dtype(cdt).itemsize

    # Per-chip VMEM ceiling (v5e/v6e: 128 MiB phys; v7x: 64 MiB). Conservative fallback.
    try:
        vmem_cap = int(pltpu.get_tpu_info().vmem_capacity_bytes)
    except Exception:
        vmem_cap = 64 << 20
    vmem_ceiling = min(vmem_cap * 3 // 4, 100 << 20)   # max scoped VMEM we request
    budget = min(24 << 20, vmem_ceiling)               # per-step working-set target

    block_b = _choose_block_b(B, L, S, D, Tm2, Cpad, hid_item, budget)
    nb = B // block_b
    est = _vmem_bytes(L, block_b, S, D, Tm2, Cpad, hid_item)
    # Never below the v6e/v7x default (32 MiB), never above the per-chip ceiling.
    # If even block_b=1 exceeds the ceiling we still clamp (shrinking block_b first
    # is always preferred and already done above).
    vmem_limit = int(min(max(est, 32 << 20), vmem_ceiling))

    # Pad head params so the output minor dim is a multiple of 128 (unmasked stores).
    w_pad = jnp.zeros((D, Cpad), cdt).at[:, :C].set(w.astype(cdt))
    b_pad = jnp.zeros((1, Cpad), jnp.float32).at[:, :C].set(
        b.reshape(1, C).astype(jnp.float32))

    kern = functools.partial(_pool_mix_linear_kernel,
                             L=L, S=S, D=D, Tm2=Tm2, block_b=block_b)

    in_specs = [pl.BlockSpec((block_b, Tm2, 2), lambda i: (i, 0, 0))]        # spans
    in_specs += [pl.BlockSpec((block_b, S, D), lambda i: (i, 0, 0))          # layers
                 for _ in range(L)]
    in_specs += [
        pl.BlockSpec(memory_space=pltpu.MemorySpace.SMEM),                   # mix coeffs
        pl.BlockSpec((D, Cpad), lambda i: (0, 0)),                           # W (padded)
        pl.BlockSpec((1, Cpad), lambda i: (0, 0)),                           # b (padded)
    ]

    logits_pad = pl.pallas_call(
        kern,
        out_shape=jax.ShapeDtypeStruct((B, Tm2, Cpad), jnp.float32),
        grid=(nb,),
        in_specs=in_specs,
        out_specs=pl.BlockSpec((block_b, Tm2, Cpad), lambda i: (i, 0, 0)),
        compiler_params=pltpu.CompilerParams(
            dimension_semantics=("parallel",),
            vmem_limit_bytes=vmem_limit),
    )(spans_se, *hidden_list, coeffs, w_pad, b_pad)

    return logits_pad[:, :, :C]


# --------------------------------------------------------------------------------------
# Forward wrapper: span bookkeeping, kernel call, tiny (XLA-fused) argmax epilogue
# --------------------------------------------------------------------------------------
def xpos_head_forward(params, hidden_list, token_spans, tree_is_gold=None, tags=None):
    token_spans = token_spans.astype(jnp.int32)
    valid = jnp.all(token_spans > 0, axis=-1)                        # [B, T]
    token_counts = valid.sum(-1).astype(jnp.int32) - 1               # [B]

    ns = token_spans[:, 1:, :]                                       # drop special row 0
    row_idx = jnp.arange(ns.shape[1], dtype=jnp.int32)[None, :]
    ns = jnp.where((row_idx == token_counts[:, None])[..., None], 0, ns)  # zero row @ count
    ns = ns[:, :-1, :]                      # drop last pooled token BEFORE pooling

    coeffs = (params["gamma"] * jax.nn.softmax(params["scalar_parameters"])
              ).astype(jnp.float32)

    logits = pool_mix_linear(hidden_list, ns, coeffs,
                             params["w"], params["b"])               # [B, T-2, C] f32

    # Static-width mask (== logits token dim); jit-friendly equivalent of the torch mask.
    Tm2 = logits.shape[1]
    mask = (jnp.arange(Tm2, dtype=jnp.int32)[None, :] < token_counts[:, None]
            ).astype(jnp.int32)
    # TODO(synk): use_gold_tags_only branch would AND the mask with tree_is_gold here.

    # Legacy F.softmax (no dim) on a 3-D tensor uses dim=0; faithful to the source module.
    probs = jax.nn.softmax(logits, axis=0)
    preds = jnp.argmax(probs, axis=-1).astype(jnp.int32) * mask

    # TODO(synk): loss (sequence_cross_entropy_with_logits) and the Accuracy metric
    # (only when `tags` is provided) are not implemented here.
    return {"logits": logits, "preds": preds, "mask": mask}


# --------------------------------------------------------------------------------------
# Pure-JAX reference (mirrors the kernel's operand dtypes so bf16 inputs compare tightly)
# --------------------------------------------------------------------------------------
def _reference(params, hidden_list, token_spans):
    token_spans = token_spans.astype(jnp.int32)
    valid = jnp.all(token_spans > 0, axis=-1)
    token_counts = valid.sum(-1).astype(jnp.int32) - 1
    ns = token_spans[:, 1:, :]
    row_idx = jnp.arange(ns.shape[1], dtype=jnp.int32)[None, :]
    ns = jnp.where((row_idx == token_counts[:, None])[..., None], 0, ns)
    ns = ns[:, :-1, :]

    L = len(hidden_list)
    B, S, D = hidden_list[0].shape
    cdt = hidden_list[0].dtype
    coeffs = (params["gamma"] * jax.nn.softmax(params["scalar_parameters"])
              ).astype(jnp.float32)

    starts = ns[..., 0]
    ends = ns[..., 1]
    sub = jnp.arange(S, dtype=jnp.int32)[None, None, :]
    in_span = (sub >= starts[..., None]) & (sub < ends[..., None])
    inv_len = (1.0 / jnp.maximum(ends - starts, 1).astype(jnp.float32))[..., None]
    pool_f32 = in_span.astype(jnp.float32) * inv_len

    pooled = jnp.zeros((B, ns.shape[1], D), jnp.float32)
    for k in range(L):
        pm_k = (pool_f32 * coeffs[k]).astype(cdt)
        pooled = pooled + jnp.einsum("bts,bsd->btd", pm_k, hidden_list[k],
                                     preferred_element_type=jnp.float32)

    logits = (jnp.einsum("btd,dc->btc", pooled.astype(cdt), params["w"].astype(cdt),
                         preferred_element_type=jnp.float32)
              + params["b"].reshape(1, 1, -1).astype(jnp.float32))

    Tm2 = logits.shape[1]
    mask = (jnp.arange(Tm2, dtype=jnp.int32)[None, :] < token_counts[:, None]
            ).astype(jnp.int32)
    probs = jax.nn.softmax(logits, axis=0)       # legacy F.softmax dim=0 for 3-D
    preds = jnp.argmax(probs, axis=-1).astype(jnp.int32) * mask
    return logits, preds


if __name__ == "__main__":
    B, T, S, D, L, C = 2, 8, 16, 32, 3, 10   # batch, tokens(+specials), subwords, dim, layers, tags

    key = jax.random.PRNGKey(0)
    k_h, k_w, k_b, k_m = jax.random.split(key, 4)
    # bf16 activations: native fast MXU path, half the HBM traffic vs f32.
    hidden_list = [
        jax.random.normal(jax.random.fold_in(k_h, i), (B, S, D), jnp.float32)
        .astype(jnp.bfloat16)
        for i in range(L)
    ]

    params = {
        "w": 0.02 * jax.random.normal(k_w, (D, C), jnp.float32),    # Linear weight [in, out]
        "b": 0.01 * jax.random.normal(k_b, (1, C), jnp.float32),    # Linear bias
        "scalar_parameters": 0.1 * jax.random.normal(k_m, (L,), jnp.float32),  # ScalarMix
        "gamma": jnp.float32(1.0),
    }

    # (start, end) subword spans; row 0 is [CLS] (start=0 -> not counted), trailing (0,0)=pad.
    token_spans = jnp.array(
        [
            [[0, 1], [1, 2], [2, 4], [4, 5], [5, 8], [8, 9], [9, 12], [12, 13]],
            [[0, 1], [1, 3], [3, 4], [4, 6], [6, 7], [7, 8], [0, 0], [0, 0]],
        ],
        dtype=jnp.int32,
    )
    tree_is_gold = jnp.ones((B,), jnp.int32)   # unused (use_gold_tags_only=False)

    fwd = jax.jit(xpos_head_forward)
    out = fwd(params, hidden_list, token_spans, tree_is_gold)
    jax.block_until_ready(out)

    ref_logits, ref_preds = _reference(params, hidden_list, token_spans)
    assert out["logits"].shape == (B, T - 2, C)
    assert out["preds"].shape == (B, T - 2)
    assert jnp.allclose(out["logits"], ref_logits, atol=2e-3, rtol=1e-2), "logits mismatch"
    assert jnp.array_equal(out["preds"], ref_preds), "preds mismatch"

    print("KERNEL_OK")
</pallas_src>

<mosaic_0001>
module attributes {stable_mosaic.version = 11 : i64} {
  func.func @_pool_mix_linear_kernel(%arg0: i32, %arg1: memref<1x6x2xi32, #tpu.memory_space<vmem>>, %arg2: memref<1x16x32xbf16, #tpu.memory_space<vmem>>, %arg3: memref<1x16x32xbf16, #tpu.memory_space<vmem>>, %arg4: memref<1x16x32xbf16, #tpu.memory_space<vmem>>, %arg5: memref<3xf32, #tpu.memory_space<smem>>, %arg6: memref<32x128xbf16, #tpu.memory_space<vmem>>, %arg7: memref<1x128xf32, #tpu.memory_space<vmem>>, %arg8: memref<1x6x128xf32, #tpu.memory_space<vmem>>) attributes {dimension_semantics = [#tpu.dimension_semantics<parallel>], iteration_bounds = array<i64: 2>, scalar_prefetch = 0 : i64, scratch_operands = 0 : i64, tpu.core_type = #tpu.core_type<tc>, window_params = [{transform_indices = @transform_0, window_bounds = array<i64: 1, 6, 2>}, {transform_indices = @transform_1, window_bounds = array<i64: 1, 16, 32>}, {transform_indices = @transform_2, window_bounds = array<i64: 1, 16, 32>}, {transform_indices = @transform_3, window_bounds = array<i64: 1, 16, 32>}, {transform_indices = @transform_4, window_bounds = array<i64: 3>}, {pipeline_mode = #tpu.pipeline_mode<synchronous>, transform_indices = @transform_5, window_bounds = array<i64: 32, 128>}, {pipeline_mode = #tpu.pipeline_mode<synchronous>, transform_indices = @transform_6, window_bounds = array<i64: 1, 128>}, {transform_indices = @transform_7, window_bounds = array<i64: 1, 6, 128>}]} {
    %c0 = arith.constant 0 : index
    %c0_0 = arith.constant 0 : index
    %c0_1 = arith.constant 0 : index
    %0 = vector.load %arg1[%c0, %c0_0, %c0_1] : memref<1x6x2xi32, #tpu.memory_space<vmem>>, vector<1x6x2xi32>
    %1 = vector.extract_strided_slice %0 {offsets = [0, 0, 0], sizes = [1, 6, 1], strides = [1, 1, 1]} : vector<1x6x2xi32> to vector<1x6x1xi32>
    %2 = vector.extract_strided_slice %0 {offsets = [0, 0, 1], sizes = [1, 6, 1], strides = [1, 1, 1]} : vector<1x6x2xi32> to vector<1x6x1xi32>
    %3 = tpu.iota {dimensions = array<i32: 2>} : vector<1x1x16xi32>
    %4 = vector.broadcast %3 : vector<1x1x16xi32> to vector<1x6x16xi32>
    %5 = vector.broadcast %1 : vector<1x6x1xi32> to vector<1x6x16xi32>
    %6 = arith.cmpi sge, %4, %5 : vector<1x6x16xi32>
    %7 = vector.broadcast %3 : vector<1x1x16xi32> to vector<1x6x16xi32>
    %8 = vector.broadcast %2 : vector<1x6x1xi32> to vector<1x6x16xi32>
    %9 = arith.cmpi slt, %7, %8 : vector<1x6x16xi32>
    %10 = arith.andi %6, %9 : vector<1x6x16xi1>
    %11 = arith.subi %2, %1 : vector<1x6x1xi32>
    %c1_i32 = arith.constant 1 : i32
    %12 = vector.broadcast %c1_i32 : i32 to vector<1x6x1xi32>
    %13 = arith.maxsi %11, %12 : vector<1x6x1xi32>
    %14 = arith.sitofp %13 : vector<1x6x1xi32> to vector<1x6x1xf32>
    %cst = arith.constant 1.000000e+00 : f32
    %15 = vector.broadcast %cst : f32 to vector<1x6x1xf32>
    %16 = arith.divf %15, %14 : vector<1x6x1xf32>
    %17 = arith.extui %10 : vector<1x6x16xi1> to vector<1x6x16xi32>
    %18 = arith.sitofp %17 : vector<1x6x16xi32> to vector<1x6x16xf32>
    %19 = vector.broadcast %16 : vector<1x6x1xf32> to vector<1x6x16xf32>
    %20 = arith.mulf %18, %19 : vector<1x6x16xf32>
    %cst_2 = arith.constant 0.000000e+00 : f32
    %21 = vector.broadcast %cst_2 : f32 to vector<1x6x32xf32>
    %c0_3 = arith.constant 0 : index
    %22 = memref.load %arg5[%c0_3] : memref<3xf32, #tpu.memory_space<smem>>
    %23 = vector.broadcast %22 : f32 to vector<1x6x16xf32>
    %24 = arith.mulf %20, %23 : vector<1x6x16xf32>
    %25 = arith.truncf %24 : vector<1x6x16xf32> to vector<1x6x16xbf16>
    %c0_4 = arith.constant 0 : index
    %c0_5 = arith.constant 0 : index
    %c0_6 = arith.constant 0 : index
    %26 = vector.load %arg2[%c0_4, %c0_5, %c0_6] : memref<1x16x32xbf16, #tpu.memory_space<vmem>>, vector<1x16x32xbf16>
    "tpu.trace_start"() <{level = 10 : i32, message = "bts,bsd->btd"}> : () -> ()
    %cst_7 = arith.constant dense<0.000000e+00> : vector<1x6x32xf32>
    %27 = tpu.matmul %25, %26, %cst_7 {dimension_numbers = #tpu.dot_dimension_numbers<[2], [1], [1], [2], [0, 0, 0, 1, 1, 2], [0], [0]>} : vector<1x6x16xbf16>, vector<1x16x32xbf16>, vector<1x6x32xf32> -> vector<1x6x32xf32>
    "tpu.trace_stop"() : () -> ()
    %28 = arith.addf %21, %27 : vector<1x6x32xf32>
    %c1 = arith.constant 1 : index
    %29 = memref.load %arg5[%c1] : memref<3xf32, #tpu.memory_space<smem>>
    %30 = vector.broadcast %29 : f32 to vector<1x6x16xf32>
    %31 = arith.mulf %20, %30 : vector<1x6x16xf32>
    %32 = arith.truncf %31 : vector<1x6x16xf32> to vector<1x6x16xbf16>
    %c0_8 = arith.constant 0 : index
    %c0_9 = arith.constant 0 : index
    %c0_10 = arith.constant 0 : index
    %33 = vector.load %arg3[%c0_8, %c0_9, %c0_10] : memref<1x16x32xbf16, #tpu.memory_space<vmem>>, vector<1x16x32xbf16>
    "tpu.trace_start"() <{level = 10 : i32, message = "bts,bsd->btd"}> : () -> ()
    %cst_11 = arith.constant dense<0.000000e+00> : vector<1x6x32xf32>
    %34 = tpu.matmul %32, %33, %cst_11 {dimension_numbers = #tpu.dot_dimension_numbers<[2], [1], [1], [2], [0, 0, 0, 1, 1, 2], [0], [0]>} : vector<1x6x16xbf16>, vector<1x16x32xbf16>, vector<1x6x32xf32> -> vector<1x6x32xf32>
    "tpu.trace_stop"() : () -> ()
    %35 = arith.addf %28, %34 : vector<1x6x32xf32>
    %c2 = arith.constant 2 : index
    %36 = memref.load %arg5[%c2] : memref<3xf32, #tpu.memory_space<smem>>
    %37 = vector.broadcast %36 : f32 to vector<1x6x16xf32>
    %38 = arith.mulf %20, %37 : vector<1x6x16xf32>
    %39 = arith.truncf %38 : vector<1x6x16xf32> to vector<1x6x16xbf16>
    %c0_12 = arith.constant 0 : index
    %c0_13 = arith.constant 0 : index
    %c0_14 = arith.constant 0 : index
    %40 = vector.load %arg4[%c0_12, %c0_13, %c0_14] : memref<1x16x32xbf16, #tpu.memory_space<vmem>>, vector<1x16x32xbf16>
    "tpu.trace_start"() <{level = 10 : i32, message = "bts,bsd->btd"}> : () -> ()
    %cst_15 = arith.constant dense<0.000000e+00> : vector<1x6x32xf32>
    %41 = tpu.matmul %39, %40, %cst_15 {dimension_numbers = #tpu.dot_dimension_numbers<[2], [1], [1], [2], [0, 0, 0, 1, 1, 2], [0], [0]>} : vector<1x6x16xbf16>, vector<1x16x32xbf16>, vector<1x6x32xf32> -> vector<1x6x32xf32>
    "tpu.trace_stop"() : () -> ()
    %42 = arith.addf %35, %41 : vector<1x6x32xf32>
    %c0_16 = arith.constant 0 : index
    %c0_17 = arith.constant 0 : index
    %43 = vector.load %arg6[%c0_16, %c0_17] : memref<32x128xbf16, #tpu.memory_space<vmem>>, vector<32x128xbf16>
    %44 = vector.shape_cast %43 : vector<32x128xbf16> to vector<1x32x128xbf16>
    %45 = arith.truncf %42 : vector<1x6x32xf32> to vector<1x6x32xbf16>
    "tpu.trace_start"() <{level = 10 : i32, message = "btd,bdc->btc"}> : () -> ()
    %cst_18 = arith.constant dense<0.000000e+00> : vector<1x6x128xf32>
    %46 = tpu.matmul %45, %44, %cst_18 {dimension_numbers = #tpu.dot_dimension_numbers<[2], [1], [1], [2], [0, 0, 0, 1, 1, 2], [0], [0]>} : vector<1x6x32xbf16>, vector<1x32x128xbf16>, vector<1x6x128xf32> -> vector<1x6x128xf32>
    "tpu.trace_stop"() : () -> ()
    %c0_19 = arith.constant 0 : index
    %c0_20 = arith.constant 0 : index
    %47 = vector.load %arg7[%c0_19, %c0_20] : memref<1x128xf32, #tpu.memory_space<vmem>>, vector<1x128xf32>
    %48 = vector.shape_cast %47 : vector<1x128xf32> to vector<1x1x128xf32>
    %49 = vector.broadcast %48 : vector<1x1x128xf32> to vector<1x6x128xf32>
    %50 = arith.addf %46, %49 : vector<1x6x128xf32>
    %c0_21 = arith.constant 0 : index
    %c0_22 = arith.constant 0 : index
    %c0_23 = arith.constant 0 : index
    %51 = vector.load %arg8[%c0_21, %c0_22, %c0_23] : memref<1x6x128xf32, #tpu.memory_space<vmem>>, vector<1x6x128xf32>
    tpu.vector_store %arg8[%c0_21, %c0_22, %c0_23], %50 {strides = array<i32>} : memref<1x6x128xf32, #tpu.memory_space<vmem>>, vector<1x6x128xf32>,
    return
  }
  func.func @transform_0(%arg0: i32) -> (i32, i32, i32) {
    %c0_i32 = arith.constant 0 : i32
    %c0_i32_0 = arith.constant 0 : i32
    %c0_i32_1 = arith.constant 0 : i32
    return %arg0, %c0_i32, %c0_i32_0 : i32, i32, i32
  }
  func.func @transform_1(%arg0: i32) -> (i32, i32, i32) {
    %c0_i32 = arith.constant 0 : i32
    %c0_i32_0 = arith.constant 0 : i32
    %c0_i32_1 = arith.constant 0 : i32
    return %arg0, %c0_i32, %c0_i32_0 : i32, i32, i32
  }
  func.func @transform_2(%arg0: i32) -> (i32, i32, i32) {
    %c0_i32 = arith.constant 0 : i32
    %c0_i32_0 = arith.constant 0 : i32
    %c0_i32_1 = arith.constant 0 : i32
    return %arg0, %c0_i32, %c0_i32_0 : i32, i32, i32
  }
  func.func @transform_3(%arg0: i32) -> (i32, i32, i32) {
    %c0_i32 = arith.constant 0 : i32
    %c0_i32_0 = arith.constant 0 : i32
    %c0_i32_1 = arith.constant 0 : i32
    return %arg0, %c0_i32, %c0_i32_0 : i32, i32, i32
  }
  func.func @transform_4(%arg0: i32) -> i32 {
    %c0_i32 = arith.constant 0 : i32
    %c0_i32_0 = arith.constant 0 : i32
    return %c0_i32 : i32
  }
  func.func @transform_5(%arg0: i32) -> (i32, i32) {
    %c0_i32 = arith.constant 0 : i32
    %c0_i32_0 = arith.constant 0 : i32
    %c0_i32_1 = arith.constant 0 : i32
    return %c0_i32, %c0_i32_0 : i32, i32
  }
  func.func @transform_6(%arg0: i32) -> (i32, i32) {
    %c0_i32 = arith.constant 0 : i32
    %c0_i32_0 = arith.constant 0 : i32
    %c0_i32_1 = arith.constant 0 : i32
    return %c0_i32, %c0_i32_0 : i32, i32
  }
  func.func @transform_7(%arg0: i32) -> (i32, i32, i32) {
    %c0_i32 = arith.constant 0 : i32
    %c0_i32_0 = arith.constant 0 : i32
    %c0_i32_1 = arith.constant 0 : i32
    return %arg0, %c0_i32, %c0_i32_0 : i32, i32, i32
  }
}

</mosaic_0001>

<bundles_post_ra>
// kernel: xpos_head_forward.1
= control target key start
LH: loop header
LB: loop body
LE: loop exit
PB: predicated region body
PF: predicated region fallthrough
CT: control target
= control target key end

     0   :  { %12 = vsyncpa [#allocation3], 0  ;;  %s889_s24 = smov 0   ;;  %s957_s0 = inlined_call_operand.vmem [shape: s32[2,6,2], index: 0, kind: input, shape index: {}]   ;;  %s958_s1 = inlined_call_operand.vmem [shape: bf16[2,16,32], index: 1, kind: input, shape index: {}]   ;;  %s959_s2 = inlined_call_operand.vmem [shape: bf16[2,16,32], index: 2, kind: input, shape index: {}]   ;;  %s960_s3 = inlined_call_operand.vmem [shape: bf16[2,16,32], index: 3, kind: input, shape index: {}]   ;;  %s961_s4 = inlined_call_operand.vmem [shape: f32[3], index: 4, kind: input, shape index: {}]   ;;  %s962_s5 = inlined_call_operand.vmem [shape: bf16[32,128], index: 5, kind: input, shape index: {}]   ;;  %s963_s6 = inlined_call_operand.vmem [shape: f32[1,128], index: 6, kind: input, shape index: {}]   ;;  %s964_s7 = inlined_call_operand.vmem [shape: f32[2,6,128], index: 7, kind: output, shape index: {}]  }
   0x1 LB: > { %s895_s25 = sadd.s32 4294967295, %s841_s24   ;;  %p716_p0 = scmp.ge.s32.totalorder %s841_s24, 1  ;;  %s841_s24 = sphi %s889_s24, %s18_s24  }
   0x2   : > { %p216_p1 = scmp.lt.s32.totalorder %s841_s24, 3  ;;  %s229_s28 = sshll.u32 %s961_s4, 4  ;;  %s230_s28 = int_to_ptr.vmem [resolvable:$true] %s229_s28 }
   0x3   : > { %p790_p3 = scmp.eq.s32.totalorder %s895_s25, 0  ;;  %s816_s30 = scalar_lea.vmem %s230_s28, 16 }
   0x4   : > { %p902_p2 = pnand %p716_p0, %p216_p1  ;;  %p817_p6 = scmp.ne.s32.totalorder %s230_s28, %s816_s30 }
   0x5   : > { %p824_p10 = scmp.lt.s32.totalorder %s230_s28, %s230_s28  ;;  %p825_p11 = scmp.lt.s32.totalorder %s816_s30, %s816_s30 }
   0x6   : > { %p786_p4 = pneg %p902_p2 }
   0x7   : > { %p826_p12 = por %p825_p11, %p824_p10 }
   0x8   : > { %p787_p5 = pnand %p790_p3, %p786_p4 }
   0xa   : > { %p818_p7 = pneg %p787_p5 }
   0xc   : > { %p819_p8 = pnand %p818_p7, %p817_p6 }
   0xe   : > { %p820_p9 = pneg %p819_p8 }
  0x10   : > { %p827_p13 = pnand %p826_p12, %p820_p9 }
  0x12   : > { %830 = shalt.err (!%p827_p13)
}
  0x13   : > { %s843_s8 = smov [#allocation2]   ;;  %279 = sbr.rel (%p902_p2) target bundleno = 702 (0x2be), region = 48 }
  0x14   : > { %789 = dma.vmem_to_smem (!%p787_p5), %s230_s28, 16, %s843_s8, [#allocation3]  }
  0x18   : > { %836 = dma.done.wait (%p790_p3), [#allocation3], 16  }
  0x19   : > { %838 = vsyncadd (%p790_p3), [#allocation3], 4294967280 }
  0x1a   : > { %285 = sfence }
  0x1b   : > { %p325_p0 = scmp.lt.s32.totalorder %s895_s25, 1  ;;  %v844_v0 = vmov 1   ;;  %v845_v1 = vmov 0   ;;  %s846_s13 = smov 1   ;;  %v847_v3 = vmov 0.0   ;;  %vm848_vm1 = vmmov 0  }
  0x1c   : > { %807 = vset.pattern.permute.xlu1 %v844_v0  ;;  %806 = vset.pattern.permute.xlu0 %v845_v1  ;;  %v350_v11 = vlaneseq  ;;  %s377_s23 = sld [smem:[#allocation2]]  ;;  %vm395_vm5 = vcmask 130048   ;;  %v812_v28 = vld [vmem:[%s962_s5 + $0x8] sm:$0xff]   ;;  %v813_v29 = vld [vmem:[%s962_s5] sm:$0xff]   ;;  %vm568_vm6 = vcmask 261120  }
  0x1d   : > { %s967_s25 = smov (!%p325_p0, %s895_s25), 1  ;;  %756 = vmatprep.subr.bf16.mxu0 %v847_v3  ;;  %762 = vmatprep.subr.bf16.mxu1 %v847_v3  ;;  %s735_s26 = sld [smem:[#allocation2 + $0x2]]  ;;  %v738_v45 = vld [vmem:[%s963_s6] ss:$0 sm:$0xff] }
  0x1e   : > { %s919_s9 = sshll.u32 %s967_s25, 3  ;;  %758 = vmatprep.mubr.msk.bf16.mxu0 %vm848_vm1, %v847_v3  ;;  %764 = vmatprep.mubr.msk.bf16.mxu1 %vm848_vm1, %v847_v3  ;;  %v351_v12 = vand.u32 127, %v350_v11  ;;  %s730_s25 = sld [smem:[#allocation2 + $0x1]] }
  0x1f   : > { %s328_s12 = scalar_lea.vmem %s957_s0, %s919_s9  ;;  %s338_s16 = scalar_lea.vmem %s959_s2, %s919_s9 }
  0x20   : > { %v349_v2 = vld [vmem:[%s328_s12] sm:$0x3f]  ;;  %s333_s19 = scalar_lea.vmem %s958_s1, %s919_s9  ;;  %s343_s22 = scalar_lea.vmem %s960_s3, %s919_s9 }
  0x21   : > { %361 = vrot.lane.b32.xlu0 %v349_v2, %s846_s13  ;;  %357 = vperm.xlu1 %807, %v349_v2   ;;  %v809_v8 = vld [vmem:[%s338_s16] sm:$0xff]   ;;  %s347_s13 = scalar_lea.vmem %s964_s7, %s919_s9 }
  0x22   : > { %v810_v9 = vld [vmem:[%s333_s19] sm:$0xff]   ;;  %757 = vmatpush3.bf16.msra.mxu0 %v809_v8  ;;  %v378_v16 = vstv %s377_s23 }
  0x23   : > { %763 = vmatpush3.bf16.msra.mxu1 %v810_v9  ;;  %768 = vmatprep.subr.bf16.mxu0 %v847_v3  ;;  %v811_v22 = vld [vmem:[%s343_s22] sm:$0xff]   ;;  %v489_v25 = vstv %s735_s26 }
  0x24   : > { %774 = vmatprep.subr.bf16.mxu1 %v847_v3  ;;  %v384_v17 = vstv %s730_s25 }
  0x25   : > { %353 = vperm.xlu0 %806, %v349_v2  }
  0x29   : > { %808 = vset.pattern.permute.xlu0 %v844_v0 }
  0x93   : > { %v362_v4 = vpop.permute.xlu0 %361 }
  0x94   : > { %v363_v5 = vsub.s32 %v349_v2, %v362_v4 }
  0x96   : > { %vm364_vm0 = vcmp.gt.s32.totalorder %v363_v5, 1 }
  0x97   : > { %v365_v6 = vsel %vm364_vm0, %v363_v5, 1 }
  0x98   : > { %v366_v7 = vcvt.s32.f32 %v365_v6 }
  0x9a   : > { %814 = vrcp.f32 %v366_v7 }
  0x9c   : > { %v358_v13 = vpop.permute.xlu1 %357 }
  0x9d   : > { %vm359_vm2 = vcmp.lt.s32.totalorder %v351_v12, %v358_v13 }
  0xa0   : > { %v354_v14 = vpop.permute.xlu0 %353 }
  0xa1   : > { %vm355_vm3 = vcmp.ge.s32.totalorder %v351_v12, %v354_v14 }
  0xa2   : > { %vm360_vm4 = vmand %vm355_vm3, %vm359_vm2 }
  0xa3   : > { %v729_v15 = vsel %vm360_vm4, 1.0, %v847_v3 }
  0xa7   : > { %v815_v10 = vpop.eup %814 }
  0xa8   : > { %373 = vperm.xlu1 %807, %v815_v10  }
 0x123   : > { %v374_v18 = vpop.permute.xlu1 %373 }
 0x124   : > { %v376_v19 = vmul.f32 %v729_v15, %v374_v18 }
 0x126   : > { %v379_v20 = vmul.f32 %v378_v16, %v376_v19  ;;  %v385_v21 = vmul.f32 %v384_v17, %v376_v19  ;;  %v490_v26 = vmul.f32 %v489_v25, %v376_v19 }
 0x128   : > { %v380_v23 = vpack.c.bf16 %v379_v20, %v379_v20  ;;  %v386_v24 = vpack.c.bf16 %v385_v21, %v385_v21  ;;  %v491_v27 = vpack.c.bf16 %v490_v26, %v490_v26 }
 0x12a   : > { %759 = vmatmul.mubr.msk.bf16.vlgmr.msra.gmra.mxu0 %vm395_vm5, %v386_v24  ;;  %765 = vmatmul.mubr.msk.bf16.vlgmr.msra.gmra.mxu1 %vm395_vm5, %v380_v23 }
 0x12b   : > { %769 = vmatpush3.bf16.msra.mxu0 %v811_v22  ;;  %770 = vmatprep.mubr.msk.bf16.mxu0 %vm848_vm1, %v847_v3 }
 0x12c   : > { %778 = vmatprep.mubr.msk.bf16.mxu1 %vm848_vm1, %v847_v3  ;;  %775 = vmatpush3.bf16.msra.mxu1 %v812_v28 }
 0x12d   : > { %776 = vmatprep.subr.bf16.mxu1 %v847_v3 }
 0x130   : > { %777 = vmatpush3.bf16.msra.mxu1 %v813_v29 }
 0x132   : > { %771 = vmatmul.mubr.msk.bf16.vlgmr.msra.gmra.mxu0 %vm395_vm5, %v491_v27 }
 0x1ea   : > { %v433_v30 = vpop.f32.mrf.mxu0  ;;  %v482_v31 = vpop.f32.mrf.mxu1 }
 0x1eb   : > { %v483_v38 = vadd.f32 %v482_v31, %v433_v30 }
 0x1ec   : > { %v760_v32 = vpop.f32.mrf.mxu0  ;;  %v766_v33 = vpop.f32.mrf.mxu1 }
 0x1ee   : > { %v436_v34 = vpop.f32.mrf.mxu0  ;;  %v485_v35 = vpop.f32.mrf.mxu1 }
 0x1f0   : > { %v761_v36 = vpop.f32.mrf.mxu0  ;;  %v767_v37 = vpop.f32.mrf.mxu1 }
 0x1f2   : > { %v537_v39 = vpop.f32.mrf.mxu0 }
 0x1f3   : > { %v543_v40 = vadd.f32 %v537_v39, %v483_v38 }
 0x1f4   : > { %v772_v41 = vpop.f32.mrf.mxu0 }
 0x1f5   : > { %v548_v42 = vpack.c.bf16 %v543_v40, %v543_v40 }
 0x1f6   : > { %v540_v43 = vpop.f32.mrf.mxu0 }
 0x1f7   : > { %779 = vmatmul.mubr.msk.bf16.vlgmr.msra.gmra.mxu1 %vm568_vm6, %v548_v42 }
 0x1f8   : > { %v773_v44 = vpop.f32.mrf.mxu0 }
 0x2b7   : > { %v606_v46 = vpop.f32.mrf.mxu1 }
 0x2b8   : > { %v607_v47 = vadd.f32 %v738_v45, %v606_v46 }
 0x2b9   : > { %v780_v48 = vpop.f32.mrf.mxu1 }
 0x2ba   : > { %612 = vst [vmem:[%s347_s13] sm:$0x3f] %v607_v47 }
 0x2bb   : > { %v609_v49 = vpop.f32.mrf.mxu1 }
 0x2bd   : > { %v781_v50 = vpop.f32.mrf.mxu1 }
 0x2be PF: > { %s18_s24 = sadd.s32 1, %s841_s24  }
 0x2bf   : > { %p15_p1 = scmp.ge.s32.totalorder %s18_s24, 4  }
 0x2c1   :  { %17 = sbr.rel (!%p15_p1) target bundleno = 1 (0x1), region = 92 }
 0x2c6   :  { %632 = vsyncpa [#allocation3], 1 }
 0x2c7   :  { %634 = vsyncpa [#allocation3 + $0x1], 1 }

</bundles_post_ra>
